<compile_context>
chip_gen: v7x
topology: tpu7x:2x2x1
jax: 0.10.0
libtpu: 0.0.40
codegen_flags: <defaults>
</compile_context>

<pallas_src>
import functools

import jax
import jax.numpy as jnp
from jax.experimental import pallas as pl
from jax.experimental.pallas import tpu as pltpu


def _round_up(x, m):
    return (x + m - 1) // m * m


def _linear_kernel(x_ref, w_ref, b_ref, o_ref):
    """One (tm, tn) output tile, accumulated over the K grid axis.

    x_ref: [tm, tk] bf16   w_ref: [tk, tn] bf16   b_ref: [1, tn] f32
    o_ref: [tm, tn] f32 -- same block index for every k, so it stays resident
    across the K axis and doubles as the f32 accumulator (no scratch needed).
    """

    @pl.when(pl.program_id(2) == 0)
    def _():
        # Fold the bias into the accumulator init instead of a finalize pass.
        o_ref[...] = jnp.broadcast_to(b_ref[...], o_ref.shape)

    # bf16 x bf16 -> f32 accumulation on the MXU.
    o_ref[...] += jnp.dot(
        x_ref[...], w_ref[...], preferred_element_type=jnp.float32
    )


@functools.partial(jax.jit, static_argnames=("tm", "tn", "tk", "m_pad", "k_pad"))
def _linear_forward(x, w_t, b, *, tm, tn, tk, m_pad, k_pad):
    """y = x @ w_t + b via a tiled Pallas matmul.

    x:   [M, K]            (cast to bf16 here)
    w_t: [K + k_pad, N]    bf16, already transposed & K-zero-padded
    b:   [1, N]            f32
    Pad -> kernel -> slice is one jitted function so the (rare) pads fuse with
    the bf16 cast and the no-op slice is elided by XLA.
    """
    M, K = x.shape
    N = w_t.shape[1]

    xb = x.astype(jnp.bfloat16)
    if m_pad or k_pad:
        # K padding is zeros on BOTH x and w (garbage K would corrupt valid
        # outputs); M padding (<=7 rows, only when M < tm and M % 8 != 0).
        xb = jnp.pad(xb, ((0, m_pad), (0, k_pad)))
    Mp, Kp = xb.shape

    # K (reduction) axis last; M / N partial boundary tiles are masked.
    grid = (pl.cdiv(Mp, tm), pl.cdiv(N, tn), Kp // tk)

    y = pl.pallas_call(
        _linear_kernel,
        out_shape=jax.ShapeDtypeStruct((Mp, N), jnp.float32),
        grid_spec=pltpu.PrefetchScalarGridSpec(
            num_scalar_prefetch=0,
            grid=grid,
            in_specs=[
                pl.BlockSpec((tm, tk), lambda i, j, k: (i, k)),
                pl.BlockSpec((tk, tn), lambda i, j, k: (k, j)),
                pl.BlockSpec((1, tn), lambda i, j, k: (0, j)),
            ],
            out_specs=pl.BlockSpec((tm, tn), lambda i, j, k: (i, j)),
        ),
        compiler_params=pltpu.CompilerParams(
            # M/N tiles independent -> shard across TensorCores (megacore);
            # K is a reduction into the resident output block -> "arbitrary".
            dimension_semantics=("parallel", "parallel", "arbitrary"),
            # Double-buffered bf16 512x1024 input tiles + f32 512x512 output
            # tile use ~6 MiB; 48 MiB leaves headroom on v7x (64 MiB physical
            # VMEM) and is far below v5e/v6e's 128 MiB.
            vmem_limit_bytes=48 * 1024 * 1024,
        ),
    )(xb, w_t, b)

    if m_pad:
        y = y[:M]
    return y


class InnerLinear:
    """Equivalent of the `other` module: nn.Linear(in_features, out_features).

    Parameters are kept PyTorch-style (weight [out, in], f32) for reference
    math; the kernel-facing copy is transposed to [K, N], zero-padded in K to
    a tile multiple and cast to bfloat16 ONCE here. bf16 operands feed the
    bf16-native MXU (v6e/v7x) and halve HBM->VMEM DMA bytes (the biggest win
    on bandwidth-limited v5e); accumulation stays f32 in the kernel.
    """

    # 512-wide M/N tiles: lane-dense output, ~85% of mem-bound roofline vs
    # ~63% at 256 (per-grid-step overhead ~0.35us), fewer HBM re-reads of X/W.
    # TK=1024 keeps typical hidden sizes to a single K step; sweep {512, 1024}.
    TM, TN, TK = 512, 512, 1024

    def __init__(self, in_features, out_features, key):
        k_w, k_b = jax.random.split(key)
        bound = 1.0 / (in_features ** 0.5)
        self.weight = jax.random.uniform(
            k_w, (out_features, in_features), jnp.float32, -bound, bound
        )
        self.bias = jax.random.uniform(
            k_b, (out_features,), jnp.float32, -bound, bound
        )

        K, N = in_features, out_features
        self._K, self._N = K, N

        # K tiling: one full-dim block when K fits a tile (no padding at all),
        # else TK-wide tiles with the weight zero-padded once.
        if K <= self.TK:
            self._tk, self._k_pad = K, 0
        else:
            self._tk = self.TK
            self._k_pad = _round_up(K, self.TK) - K

        # One-time parameter plumbing: transpose to [K, N], pad K, cast bf16.
        self._w_t = jnp.pad(
            self.weight.T, ((0, self._k_pad), (0, 0))
        ).astype(jnp.bfloat16)
        # Bias stays f32 (tiny; added in f32 inside the kernel).
        self._b = self.bias.reshape(1, N)
        # TODO(synk): on v7x an fp8 weight path (with scale handling) would
        # roughly double MXU throughput and halve weight DMA bytes again.

    def _pick_tiles(self, M):
        # M tiling: fixed TM when M is large (ragged last tile masked by
        # Pallas -> no per-call activation pad), else a single exact /
        # 8-aligned tile (<=7 pad rows, fused into the bf16 cast).
        if M >= self.TM:
            tm, m_pad = self.TM, 0
        else:
            tm = _round_up(M, 8)
            m_pad = tm - M
        grid_m = (M + m_pad + tm - 1) // tm

        # N tiling: the weight is NOT padded in N; ragged N tiles are masked
        # on the output write. When the M grid has only one tile, split N so
        # both v7x TensorCores get a "parallel" tile.
        N, TN = self._N, self.TN
        if N <= 128 or N > TN:
            tn = min(N, TN)
        elif grid_m == 1 and N % 128 == 0 and N >= 256:
            half = N // 2
            tn = half if half % 128 == 0 else 128
        else:
            tn = N  # single full-dim tile (legal: last dim equals array dim)
        return tm, m_pad, tn

    def __call__(self, x):
        *lead, K = x.shape
        assert K == self._K
        x2 = x.reshape(-1, K)
        M = x2.shape[0]
        tm, m_pad, tn = self._pick_tiles(M)
        y = _linear_forward(
            x2, self._w_t, self._b,
            tm=tm, tn=tn, tk=self._tk, m_pad=m_pad, k_pad=self._k_pad,
        )
        return y.reshape(*lead, self._N)


class NestedModule:
    """forward(x) -> self.other(x)  (pure delegation, as in the PyTorch spec)."""

    def __init__(self, other):
        self.other = other

    def __call__(self, x):
        return self.other(x)


if __name__ == "__main__":
    key = jax.random.PRNGKey(0)
    k_x, k_p, k_x2, k_p2 = jax.random.split(key, 4)

    # bf16-matched reference (same operand cast as the kernel, f32 accumulate).
    def ref(x_, inner_):
        xb = x_.astype(jnp.bfloat16).astype(jnp.float32)
        wb = inner_.weight.T.astype(jnp.bfloat16).astype(jnp.float32)
        return jnp.dot(xb, wb, precision=jax.lax.Precision.HIGHEST) + inner_.bias

    # --- small demo consistent with the module: batch=2, seq=8, hidden=32 ---
    batch, seq, hidden = 2, 8, 32
    x = jax.random.normal(k_x, (batch * seq, hidden), jnp.float32)

    inner = InnerLinear(hidden, hidden, k_p)
    model = NestedModule(inner)

    y = model(x)
    jax.block_until_ready(y)

    y_ref = ref(x, inner)
    assert y.shape == (batch * seq, hidden)
    assert jnp.allclose(y, y_ref, atol=1e-3, rtol=1e-3)

    # --- ragged shape exercising multi-tile grids, masked partial M/N tiles
    # and the K > TK zero-padded reduction path ---
    M2, K2, N2 = 640, 1152, 768
    x2 = jax.random.normal(k_x2, (M2, K2), jnp.float32)
    inner2 = InnerLinear(K2, N2, k_p2)
    model2 = NestedModule(inner2)
    y2 = model2(x2)
    jax.block_until_ready(y2)
    y2_ref = ref(x2, inner2)
    assert y2.shape == (M2, N2)
    assert jnp.allclose(y2, y2_ref, atol=5e-3, rtol=5e-3)

    print("KERNEL_OK")
</pallas_src>

<mosaic_0001>
module attributes {stable_mosaic.version = 11 : i64} {
  func.func @_linear_kernel(%arg0: i32, %arg1: i32, %arg2: i32, %arg3: memref<16x32xbf16, #tpu.memory_space<vmem>>, %arg4: memref<32x32xbf16, #tpu.memory_space<vmem>>, %arg5: memref<1x32xf32, #tpu.memory_space<vmem>>, %arg6: memref<16x32xf32, #tpu.memory_space<vmem>>) attributes {dimension_semantics = [#tpu.dimension_semantics<parallel>, #tpu.dimension_semantics<parallel>, #tpu.dimension_semantics<arbitrary>], iteration_bounds = array<i64: 1, 1, 1>, scalar_prefetch = 0 : i64, scratch_operands = 0 : i64, tpu.core_type = #tpu.core_type<tc>, window_params = [{transform_indices = @transform_0, window_bounds = array<i64: 16, 32>}, {transform_indices = @transform_1, window_bounds = array<i64: 32, 32>}, {transform_indices = @transform_2, window_bounds = array<i64: 1, 32>}, {transform_indices = @transform_3, window_bounds = array<i64: 16, 32>}]} {
    %c0_i32 = arith.constant 0 : i32
    %0 = arith.cmpi eq, %arg2, %c0_i32 : i32
    %1 = arith.extui %0 : i1 to i32
    %c0_i32_0 = arith.constant 0 : i32
    %2 = arith.cmpi ne, %1, %c0_i32_0 : i32
    scf.if %2 {
      %c0_8 = arith.constant 0 : index
      %c0_9 = arith.constant 0 : index
      %9 = vector.load %arg5[%c0_8, %c0_9] : memref<1x32xf32, #tpu.memory_space<vmem>>, vector<1x32xf32>
      %10 = vector.shape_cast %9 : vector<1x32xf32> to vector<1x32xf32>
      %11 = vector.broadcast %10 : vector<1x32xf32> to vector<16x32xf32>
      %c0_10 = arith.constant 0 : index
      %c0_11 = arith.constant 0 : index
      %12 = vector.load %arg6[%c0_10, %c0_11] : memref<16x32xf32, #tpu.memory_space<vmem>>, vector<16x32xf32>
      tpu.vector_store %arg6[%c0_10, %c0_11], %11 {strides = array<i32>} : memref<16x32xf32, #tpu.memory_space<vmem>>, vector<16x32xf32>,
    } else {
    }
    %c0 = arith.constant 0 : index
    %c0_1 = arith.constant 0 : index
    %3 = vector.load %arg6[%c0, %c0_1] : memref<16x32xf32, #tpu.memory_space<vmem>>, vector<16x32xf32>
    %c0_2 = arith.constant 0 : index
    %c0_3 = arith.constant 0 : index
    %4 = vector.load %arg3[%c0_2, %c0_3] : memref<16x32xbf16, #tpu.memory_space<vmem>>, vector<16x32xbf16>
    %c0_4 = arith.constant 0 : index
    %c0_5 = arith.constant 0 : index
    %5 = vector.load %arg4[%c0_4, %c0_5] : memref<32x32xbf16, #tpu.memory_space<vmem>>, vector<32x32xbf16>
    %cst = arith.constant dense<0.000000e+00> : vector<16x32xf32>
    %6 = tpu.matmul %4, %5, %cst {dimension_numbers = #tpu.dot_dimension_numbers<[1], [0], [0], [1], [0, 0, 1, 1], [], []>} : vector<16x32xbf16>, vector<32x32xbf16>, vector<16x32xf32> -> vector<16x32xf32>
    %7 = arith.addf %3, %6 : vector<16x32xf32>
    %c0_6 = arith.constant 0 : index
    %c0_7 = arith.constant 0 : index
    %8 = vector.load %arg6[%c0_6, %c0_7] : memref<16x32xf32, #tpu.memory_space<vmem>>, vector<16x32xf32>
    tpu.vector_store %arg6[%c0_6, %c0_7], %7 {strides = array<i32>} : memref<16x32xf32, #tpu.memory_space<vmem>>, vector<16x32xf32>,
    return
  }
  func.func @transform_0(%arg0: i32, %arg1: i32, %arg2: i32) -> (i32, i32) {
    %c0_i32 = arith.constant 0 : i32
    return %arg0, %arg2 : i32, i32
  }
  func.func @transform_1(%arg0: i32, %arg1: i32, %arg2: i32) -> (i32, i32) {
    %c0_i32 = arith.constant 0 : i32
    return %arg2, %arg1 : i32, i32
  }
  func.func @transform_2(%arg0: i32, %arg1: i32, %arg2: i32) -> (i32, i32) {
    %c0_i32 = arith.constant 0 : i32
    %c0_i32_0 = arith.constant 0 : i32
    return %c0_i32, %arg1 : i32, i32
  }
  func.func @transform_3(%arg0: i32, %arg1: i32, %arg2: i32) -> (i32, i32) {
    %c0_i32 = arith.constant 0 : i32
    return %arg0, %arg1 : i32, i32
  }
}

</mosaic_0001>

<bundles_post_ra>
// kernel: _linear_forward.1
= control target key start
LH: loop header
LB: loop body
LE: loop exit
PB: predicated region body
PF: predicated region fallthrough
CT: control target
= control target key end

     0   :  { %v168_v1 = vmov 0.0   ;;  %vm169_vm0 = vmmov 0   ;;  %vm27_vm1 = vcmask 261120   ;;  %s222_s0 = inlined_call_operand.vmem [shape: bf16[16,32], index: 0, kind: input, shape index: {}]   ;;  %s223_s1 = inlined_call_operand.vmem [shape: bf16[32,32], index: 1, kind: input, shape index: {}]   ;;  %s224_s2 = inlined_call_operand.vmem [shape: f32[1,32], index: 2, kind: input, shape index: {}]   ;;  %s225_s3 = inlined_call_operand.hbm [shape: f32[16,32], index: 3, kind: output, shape index: {}]  }
   0x1   :  { %v141_v0 = vld [vmem:[%s223_s1] sm:$0xff]   ;;  %128 = vmatprep.subr.bf16.mxu0 %v168_v1  ;;  %v142_v2 = vld [vmem:[%s223_s1 + $0x8] sm:$0xff]   ;;  %132 = vmatprep.mubr.msk.bf16.mxu0 %vm169_vm0, %v168_v1 }
   0x2   :  { %129 = vmatpush3.bf16.msra.mxu0 %v141_v0  ;;  %v120_v3 = vld [vmem:[%s224_s2] ss:$0 sm:$0xff] }
   0x3   :  { %130 = vmatprep.subr.bf16.mxu0 %v168_v1 }
   0x4   :  { %8 = vsyncpa [#allocation3], 0  ;;  %28 = vst.msk [vmem:[#allocation2] sm:$0xff] %vm27_vm1, %v120_v3  ;;  %v143_v4 = vld [vmem:[%s222_s0] sm:$0xff]   ;;  %s170_s1 = smov [#allocation2]  }
   0x5   :  { %29 = vst.msk [vmem:[#allocation2 + $0x8] sm:$0xff] %vm27_vm1, %v120_v3  ;;  %s109_s20 = sshll.u32 %s170_s1, 4  ;;  %s110_s20 = int_to_ptr.vmem [resolvable:$true] %s109_s20 }
   0x6   :  { %131 = vmatpush3.bf16.msra.mxu0 %v142_v2  ;;  %s144_s2 = scalar_lea.vmem %s110_s20, 256  ;;  %p149_p1 = scmp.lt.s32.totalorder %s110_s20, %s110_s20 }
   0x7   :  { %p145_p0 = scmp.ne.s32.totalorder %s110_s20, %s144_s2  ;;  %p150_p2 = scmp.lt.s32.totalorder %s144_s2, %s144_s2 }
   0x9   :  { %133 = vmatmul.mubr.msk.bf16.vlgmr.msra.gmra.mrb[0].mxu0 %vm27_vm1, %v143_v4  ;;  %p151_p3 = por %p150_p2, %p149_p1 }
   0xb   :  { %v30_v5 = vld [vmem:[#allocation2] sm:$0xff]  ;;  %p152_p4 = pnand %p151_p3, %p145_p0 }
   0xc   :  { %v31_v7 = vld [vmem:[#allocation2 + $0x8] sm:$0xff] }
  0xdc   :  { %v93_v6 = vpop.f32.mrb[0].mxu0 }
  0xdd   :  { %v100_v8 = vadd.f32 %v93_v6, %v30_v5  ;;  %v134_v9 = vpop.f32.mrb[1].mxu0 }
  0xde   :  { %v96_v10 = vpop.f32.mrb[2].mxu0 }
  0xdf   :  { %102 = vst.msk [vmem:[#allocation2] sm:$0xff] %vm27_vm1, %v100_v8  ;;  %v101_v11 = vadd.f32 %v96_v10, %v31_v7  ;;  %v135_v12 = vpop.f32.mrb[3].mxu0 }
  0xe1   :  { %103 = vst.msk [vmem:[#allocation2 + $0x8] sm:$0xff] %vm27_vm1, %v101_v11 }
  0xe2   :  { %155 = shalt.err (!%p152_p4)
}
  0xe3   :  { %s156_s22 = scalar_lea.hbm %s225_s3, 256 }
  0xe4   :  { %p157_p5 = scmp.ne.s32.totalorder %s225_s3, %s156_s22  ;;  %p160_p6 = scmp.lt.u32.totalorder %s156_s22, %s225_s3 }
  0xe6   :  { %p162_p7 = pnand %p160_p6, %p157_p5 }
  0xe8   :  { %165 = shalt.err (!%p162_p7)
}
  0xe9   :  { %s171_s27 = smov 128   ;;  %s172_s28 = smov 8  }
  0xea   :  { %115 = dma.vmem_to_hbm [thread:$0]  %s110_s20, 256, %s225_s3, [#allocation3], %s171_s27, %s171_s27, %s172_s28  }
  0xeb   :  { %166 = dma.done.wait [#allocation3], 256  }
  0xec   :  { %167 = vsyncadd [#allocation3], 4294967040 }
  0xed   :  { %119 = vsyncpa [#allocation3], 1 }

</bundles_post_ra>
